<compile_context>
chip_gen: v5e
topology: v5e:2x2
jax: 0.10.0
libtpu: 0.0.40
codegen_flags: <defaults>
</compile_context>

<pallas_src>
import functools

import jax
import jax.numpy as jnp
from jax.experimental import pallas as pl
from jax.experimental.pallas import tpu as pltpu


def _upsample2x_kernel(x_ref, o_ref, *, w, g):
    """x_ref: (TR, G*W) block -- G consecutive input rows packed along lanes.
    o_ref: (TR, 4*G*W) block -- the matching 2*G upsampled output rows."""
    win = g * w          # packed input row width
    w2 = 2 * win         # width of the lane-doubled (stretched) working row

    x = x_ref[...]
    # Working array of width 2*WIN; only columns < WIN carry data initially.
    u = jnp.concatenate([x, x], axis=1)
    col = jax.lax.broadcasted_iota(jnp.int32, (x.shape[0], w2), 1)

    def shift_right(v, s):
        # result[:, c] = v[:, c - s]; wrapped-around values are never selected.
        return jnp.concatenate([v[:, w2 - s:], v[:, : w2 - s]], axis=1)

    # Stretch: move element k from column k to column 2*k using masked shifts of
    # 2^b, MSB first.  A column takes the shifted value iff bit (b+1) of its index
    # is set (static masks derived from a single iota; pure selects, no arithmetic
    # on the data -> exact for Inf/NaN, no precision dependence).
    nbits = (win - 1).bit_length()
    for b in range(nbits - 1, -1, -1):
        u = jnp.where((col & (1 << (b + 1))) != 0, shift_right(u, 1 << b), u)
    # Duplicate into odd columns:  u[:, 2k] = u[:, 2k+1] = x[:, k].
    u = jnp.where((col & 1) != 0, shift_right(u, 1), u)

    # Row (H) duplication is free: each packed input row j contributes one 2W-wide
    # upsampled row, stored into two consecutive output rows (contiguous slices).
    for j in range(g):
        chunk = u[:, j * 2 * w:(j + 1) * 2 * w]
        base = j * 4 * w
        o_ref[:, base:base + 2 * w] = chunk
        o_ref[:, base + 2 * w:base + 4 * w] = chunk


def _pick_group(total_rows, w):
    """Pack G consecutive input rows into one kernel row so the kernel's output row
    width 4*G*W is a multiple of 128 lanes (or at least >= 128 when possible)."""
    for g in (1, 2, 4, 8, 16, 32):
        if total_rows % g == 0 and (g * w) % 32 == 0:
            return g
    g = 1
    while g < 32 and total_rows % (2 * g) == 0 and 4 * g * w < 128:
        g *= 2
    return g


def _pick_rows_per_block(rows, bytes_per_row):
    """Kernel rows handled per grid step (block sizing)."""
    if rows <= 16:
        return rows
    budget = 6 << 20                               # ~6 MiB of in+out blocks per step
    cap = max(8, (budget // bytes_per_row) // 8 * 8)
    half = max(8, (rows // 2) // 8 * 8)            # keep >= 2 grid steps (megacore)
    tr = min(cap, half)
    steps = -(-rows // tr)
    if steps > 2 and steps % 2 == 1:
        # Prefer an even step count: v7x's two TensorCores split the parallel axis.
        alt = -(-rows // (steps + 1))
        alt = max(8, ((alt + 7) // 8) * 8)
        if alt <= tr:
            tr = alt
    return tr


def upsample_nearest_2x(x):
    """x: (N, C, H, W) float32 -> (N, C, 2H, 2W) float32, nearest-neighbor 2x."""
    N, C, H, W = x.shape
    total_rows = N * C * H

    g = _pick_group(total_rows, W)
    rows = total_rows // g
    win = g * W
    wout = 4 * win

    x2 = x.reshape(rows, win)                      # free row-major regrouping

    tr = _pick_rows_per_block(rows, 20 * win)      # 4B * (WIN in + 4*WIN out) per row
    grid = (pl.cdiv(rows, tr),)

    out2 = pl.pallas_call(
        functools.partial(_upsample2x_kernel, w=W, g=g),
        out_shape=jax.ShapeDtypeStruct((rows, wout), x.dtype),
        grid=grid,
        in_specs=[pl.BlockSpec((tr, win), lambda i: (i, 0))],
        out_specs=pl.BlockSpec((tr, wout), lambda i: (i, 0)),
        compiler_params=pltpu.CompilerParams(
            dimension_semantics=("parallel",),
            vmem_limit_bytes=48 * 1024 * 1024,
        ),
    )(x2)

    # (rows, 4*G*W) and (N, C, 2H, 2W) share the same memory layout: free reshape.
    return out2.reshape(N, C, 2 * H, 2 * W)


if __name__ == "__main__":
    key = jax.random.PRNGKey(0)
    # net_Resize has no learnable parameters (nn.Upsample is parameter-free).
    x = jax.random.normal(key, (2, 4, 16, 16), dtype=jnp.float32)

    y = jax.block_until_ready(upsample_nearest_2x(x))

    # Reference (plain JAX) nearest-neighbor 2x upsample for verification.
    y_ref = jnp.repeat(jnp.repeat(x, 2, axis=2), 2, axis=3)

    assert y.shape == (2, 4, 32, 32), y.shape
    assert y.dtype == jnp.float32
    assert jnp.array_equal(y, y_ref), "mismatch vs reference nearest upsample"

    print("KERNEL_OK")
</pallas_src>

<mosaic_0001>
module attributes {stable_mosaic.version = 11 : i64} {
  func.func @_upsample2x_kernel(%arg0: i32, %arg1: memref<32x32xf32, #tpu.memory_space<vmem>>, %arg2: memref<32x128xf32, #tpu.memory_space<vmem>>) attributes {dimension_semantics = [#tpu.dimension_semantics<parallel>], iteration_bounds = array<i64: 2>, scalar_prefetch = 0 : i64, scratch_operands = 0 : i64, tpu.core_type = #tpu.core_type<tc>, window_params = [{transform_indices = @transform_0, window_bounds = array<i64: 32, 32>}, {transform_indices = @transform_1, window_bounds = array<i64: 32, 128>}]} {
    %c0 = arith.constant 0 : index
    %c0_0 = arith.constant 0 : index
    %0 = vector.load %arg1[%c0, %c0_0] : memref<32x32xf32, #tpu.memory_space<vmem>>, vector<32x32xf32>
    %1 = tpu.concatenate %0, %0 in 1 : vector<32x32xf32>, vector<32x32xf32> -> vector<32x64xf32>
    %2 = tpu.iota {dimensions = array<i32: 1>} : vector<32x64xi32>
    %c32_i32 = arith.constant 32 : i32
    %3 = vector.broadcast %c32_i32 : i32 to vector<32x64xi32>
    %4 = arith.andi %2, %3 : vector<32x64xi32>
    %c0_i32 = arith.constant 0 : i32
    %5 = vector.broadcast %c0_i32 : i32 to vector<32x64xi32>
    %6 = arith.cmpi ne, %4, %5 : vector<32x64xi32>
    %7 = vector.extract_strided_slice %1 {offsets = [0, 48], sizes = [32, 16], strides = [1, 1]} : vector<32x64xf32> to vector<32x16xf32>
    %8 = vector.extract_strided_slice %1 {offsets = [0, 0], sizes = [32, 48], strides = [1, 1]} : vector<32x64xf32> to vector<32x48xf32>
    %9 = tpu.concatenate %7, %8 in 1 : vector<32x16xf32>, vector<32x48xf32> -> vector<32x64xf32>
    %10 = arith.select %6, %9, %1 : vector<32x64xi1>, vector<32x64xf32>
    %c16_i32 = arith.constant 16 : i32
    %11 = vector.broadcast %c16_i32 : i32 to vector<32x64xi32>
    %12 = arith.andi %2, %11 : vector<32x64xi32>
    %c0_i32_1 = arith.constant 0 : i32
    %13 = vector.broadcast %c0_i32_1 : i32 to vector<32x64xi32>
    %14 = arith.cmpi ne, %12, %13 : vector<32x64xi32>
    %15 = vector.extract_strided_slice %10 {offsets = [0, 56], sizes = [32, 8], strides = [1, 1]} : vector<32x64xf32> to vector<32x8xf32>
    %16 = vector.extract_strided_slice %10 {offsets = [0, 0], sizes = [32, 56], strides = [1, 1]} : vector<32x64xf32> to vector<32x56xf32>
    %17 = tpu.concatenate %15, %16 in 1 : vector<32x8xf32>, vector<32x56xf32> -> vector<32x64xf32>
    %18 = arith.select %14, %17, %10 : vector<32x64xi1>, vector<32x64xf32>
    %c8_i32 = arith.constant 8 : i32
    %19 = vector.broadcast %c8_i32 : i32 to vector<32x64xi32>
    %20 = arith.andi %2, %19 : vector<32x64xi32>
    %c0_i32_2 = arith.constant 0 : i32
    %21 = vector.broadcast %c0_i32_2 : i32 to vector<32x64xi32>
    %22 = arith.cmpi ne, %20, %21 : vector<32x64xi32>
    %23 = vector.extract_strided_slice %18 {offsets = [0, 60], sizes = [32, 4], strides = [1, 1]} : vector<32x64xf32> to vector<32x4xf32>
    %24 = vector.extract_strided_slice %18 {offsets = [0, 0], sizes = [32, 60], strides = [1, 1]} : vector<32x64xf32> to vector<32x60xf32>
    %25 = tpu.concatenate %23, %24 in 1 : vector<32x4xf32>, vector<32x60xf32> -> vector<32x64xf32>
    %26 = arith.select %22, %25, %18 : vector<32x64xi1>, vector<32x64xf32>
    %c4_i32 = arith.constant 4 : i32
    %27 = vector.broadcast %c4_i32 : i32 to vector<32x64xi32>
    %28 = arith.andi %2, %27 : vector<32x64xi32>
    %c0_i32_3 = arith.constant 0 : i32
    %29 = vector.broadcast %c0_i32_3 : i32 to vector<32x64xi32>
    %30 = arith.cmpi ne, %28, %29 : vector<32x64xi32>
    %31 = vector.extract_strided_slice %26 {offsets = [0, 62], sizes = [32, 2], strides = [1, 1]} : vector<32x64xf32> to vector<32x2xf32>
    %32 = vector.extract_strided_slice %26 {offsets = [0, 0], sizes = [32, 62], strides = [1, 1]} : vector<32x64xf32> to vector<32x62xf32>
    %33 = tpu.concatenate %31, %32 in 1 : vector<32x2xf32>, vector<32x62xf32> -> vector<32x64xf32>
    %34 = arith.select %30, %33, %26 : vector<32x64xi1>, vector<32x64xf32>
    %c2_i32 = arith.constant 2 : i32
    %35 = vector.broadcast %c2_i32 : i32 to vector<32x64xi32>
    %36 = arith.andi %2, %35 : vector<32x64xi32>
    %c0_i32_4 = arith.constant 0 : i32
    %37 = vector.broadcast %c0_i32_4 : i32 to vector<32x64xi32>
    %38 = arith.cmpi ne, %36, %37 : vector<32x64xi32>
    %39 = vector.extract_strided_slice %34 {offsets = [0, 63], sizes = [32, 1], strides = [1, 1]} : vector<32x64xf32> to vector<32x1xf32>
    %40 = vector.extract_strided_slice %34 {offsets = [0, 0], sizes = [32, 63], strides = [1, 1]} : vector<32x64xf32> to vector<32x63xf32>
    %41 = tpu.concatenate %39, %40 in 1 : vector<32x1xf32>, vector<32x63xf32> -> vector<32x64xf32>
    %42 = arith.select %38, %41, %34 : vector<32x64xi1>, vector<32x64xf32>
    %c1_i32 = arith.constant 1 : i32
    %43 = vector.broadcast %c1_i32 : i32 to vector<32x64xi32>
    %44 = arith.andi %2, %43 : vector<32x64xi32>
    %c0_i32_5 = arith.constant 0 : i32
    %45 = vector.broadcast %c0_i32_5 : i32 to vector<32x64xi32>
    %46 = arith.cmpi ne, %44, %45 : vector<32x64xi32>
    %47 = vector.extract_strided_slice %42 {offsets = [0, 63], sizes = [32, 1], strides = [1, 1]} : vector<32x64xf32> to vector<32x1xf32>
    %48 = vector.extract_strided_slice %42 {offsets = [0, 0], sizes = [32, 63], strides = [1, 1]} : vector<32x64xf32> to vector<32x63xf32>
    %49 = tpu.concatenate %47, %48 in 1 : vector<32x1xf32>, vector<32x63xf32> -> vector<32x64xf32>
    %50 = arith.select %46, %49, %42 : vector<32x64xi1>, vector<32x64xf32>
    %51 = vector.extract_strided_slice %50 {offsets = [0, 0], sizes = [32, 32], strides = [1, 1]} : vector<32x64xf32> to vector<32x32xf32>
    %c0_6 = arith.constant 0 : index
    %c0_7 = arith.constant 0 : index
    %52 = vector.load %arg2[%c0_6, %c0_7] : memref<32x128xf32, #tpu.memory_space<vmem>>, vector<32x32xf32>
    tpu.vector_store %arg2[%c0_6, %c0_7], %51 {strides = array<i32>} : memref<32x128xf32, #tpu.memory_space<vmem>>, vector<32x32xf32>,
    %c0_8 = arith.constant 0 : index
    %c32 = arith.constant 32 : index
    %53 = vector.load %arg2[%c0_8, %c32] : memref<32x128xf32, #tpu.memory_space<vmem>>, vector<32x32xf32>
    tpu.vector_store %arg2[%c0_8, %c32], %51 {strides = array<i32>} : memref<32x128xf32, #tpu.memory_space<vmem>>, vector<32x32xf32>,
    %54 = vector.extract_strided_slice %50 {offsets = [0, 32], sizes = [32, 32], strides = [1, 1]} : vector<32x64xf32> to vector<32x32xf32>
    %c0_9 = arith.constant 0 : index
    %c64 = arith.constant 64 : index
    %55 = vector.load %arg2[%c0_9, %c64] : memref<32x128xf32, #tpu.memory_space<vmem>>, vector<32x32xf32>
    tpu.vector_store %arg2[%c0_9, %c64], %54 {strides = array<i32>} : memref<32x128xf32, #tpu.memory_space<vmem>>, vector<32x32xf32>,
    %c0_10 = arith.constant 0 : index
    %c96 = arith.constant 96 : index
    %56 = vector.load %arg2[%c0_10, %c96] : memref<32x128xf32, #tpu.memory_space<vmem>>, vector<32x32xf32>
    tpu.vector_store %arg2[%c0_10, %c96], %54 {strides = array<i32>} : memref<32x128xf32, #tpu.memory_space<vmem>>, vector<32x32xf32>,
    return
  }
  func.func @transform_0(%arg0: i32) -> (i32, i32) {
    %c0_i32 = arith.constant 0 : i32
    %c0_i32_0 = arith.constant 0 : i32
    return %arg0, %c0_i32 : i32, i32
  }
  func.func @transform_1(%arg0: i32) -> (i32, i32) {
    %c0_i32 = arith.constant 0 : i32
    %c0_i32_0 = arith.constant 0 : i32
    return %arg0, %c0_i32 : i32, i32
  }
}

</mosaic_0001>

<bundles_post_ra>
// kernel: tpu_custom_call.1
= control target key start
LH: loop header
LB: loop body
LE: loop exit
PB: predicated region body
PF: predicated region fallthrough
CT: control target
= control target key end

     0   :  { %6 = vsyncpa [#allocation3], 0  ;;  %s911_s0 = inlined_call_operand.vmem [shape: f32[64,32], index: 0, kind: input, shape index: {}]   ;;  %s912_s1 = inlined_call_operand.hbm [shape: f32[64,128], index: 1, kind: output, shape index: {}]  }
   0x1   :  { %8 = vsyncpa [#allocation3 + $0x1], 0  ;;  %s655_s6 = smov 0   ;;  %s657_s7 = smov 0  }
   0x2   :  { %s659_s8 = smov 0   ;;  %s661_s9 = smov 0  }
   0x3 LB: > { %s676_s10 = sadd.s32 4294967295, %s630_s9   ;;  %s503_s11 = sadd.s32 4294967294, %s630_s9   ;;  %s630_s9 = sphi %s661_s9, %s930_s9   ;;  %s626_s8 = sphi %s659_s8, %s929_s8   ;;  %s622_s7 = sphi %s657_s7, %s928_s7   ;;  %s618_s6 = sphi %s655_s6, %s927_s6  }
   0x4   : > { %s680_s12 = sadd.s32 1, %s630_s9   ;;  %s47_s13 = sadd.s32 1, %s626_s8 }
   0x5   : > { %s44_s14 = ssub.s32 %s630_s9, %s680_s12  ;;  %p57_p0 = scmp.ne.s32.totalorder %s626_s8, %s622_s7 }
   0x6   : > { %p45_p1 = scmp.eq.s32.totalorder %s44_s14, 0  ;;  %p58_p2 = scmp.eq.s32.totalorder %s676_s10, 1 }
   0x7   : > { %p63_p3 = scmp.ne.s32.totalorder %s622_s7, %s618_s6  ;;  %p64_p4 = scmp.eq.s32.totalorder %s503_s11, 1 }
   0x8   : > { %s691_s15 = scalar_select %p45_p1, %s626_s8, %s47_s13  }
   0x9   : > { %p693_p5 = por %p58_p2, %p57_p0  ;;  %p697_p6 = por %p64_p4, %p63_p3 }
   0xa   : > { %p506_p7 = scmp.ge.s32.totalorder %s630_s9, 1  ;;  %p91_p8 = scmp.lt.s32.totalorder %s630_s9, 3 }
   0xc   : > { %p92_p9 = pnand %p506_p7, %p91_p8 }
   0xd   : > { %s508_s18 = sshll.u32 (!%p92_p9), %s676_s10, 2  ;;  %s632_s23 = smov (!%p92_p9), 32  }
   0xe   : > { %95 = sbr.rel (%p92_p9) target bundleno = 1008 (0x3f0), region = 24  ;;  %p112_p10 = scmp.lt.s32.totalorder (!%p92_p9), %s508_s18, 7 }
   0xf   : > { %s633_s24 = smov (!%p92_p9), 80   ;;  %s634_s25 = smov (!%p92_p9), 16  }
  0x10   : > { %s635_s26 = smov (!%p92_p9), 72   ;;  %s636_s27 = smov (!%p92_p9), 8  }
  0x11   : > { %s637_s28 = smov (!%p92_p9), 68   ;;  %s638_s29 = smov (!%p92_p9), 4  }
  0x12   : > { %s639_s30 = smov (!%p92_p9), 66   ;;  %s640_s2 = smov (!%p92_p9), 2  }
  0x13   : > { %s932_s18 = smov (!%p112_p10, %s508_s18), 7  ;;  %vm138_vm0 = vcmask 261120   ;;  %v143_v13 = vlaneseq  ;;  %vm175_vm1 = vcmask 130048   ;;  %vm214_vm3 = vcmask 64512   ;;  %s641_s3 = smov 65  }
  0x14   : > { %s509_s19 = sshll.u32 %s932_s18, 3  ;;  %vm253_vm5 = vcmask 31744   ;;  %vm292_vm7 = vcmask 15360   ;;  %s642_s4 = smov 1   ;;  %vm331_vm9 = vcmask 7168   ;;  %vm398_vm12 = vcmask 523520  }
  0x15   : > { %s115_s22 = scalar_lea.vmem %s911_s0, %s509_s19  ;;  %v715_v14 = vand.u32 127, %v143_v13  ;;  %s108_s5 = sand.u32 1, %s622_s7   ;;  %vm403_vm13 = vcmask 785920   ;;  %vm420_vm14 = vcmask 1048320  }
  0x16   : > { %v120_v0 = vld [vmem:[%s115_s22 + $0x10] sm:$0xff]  ;;  %v118_v1 = vld [vmem:[%s115_s22] sm:$0xff]  ;;  %v121_v2 = vld [vmem:[%s115_s22 + $0x18] sm:$0xff]  ;;  %s507_s11 = sshll.u32 %s108_s5, 5  ;;  %s643_s14 = smov 64  }
  0x17   : > { %130 = vrot.lane.b32.xlu1 %v120_v0, %s632_s23  ;;  %126 = vrot.lane.b32.xlu0 %v118_v1, %s632_s23  ;;  %v119_v3 = vld [vmem:[%s115_s22 + $0x8] sm:$0xff]  ;;  %v145_v16 = vand.u32 32, %v715_v14  ;;  %v184_v34 = vand.u32 16, %v715_v14  ;;  %v223_v53 = vand.u32 8, %v715_v14  ;;  %s833_s13 = scalar_lea.vmem [#allocation2], %s507_s11  ;;  %s515_s18 = sshll.u32 %s676_s10, 5 }
  0x18   : > { %s437_s21 = scalar_lea.hbm %s912_s1, %s515_s18  ;;  %s438_s22 = sshll.u32 %s833_s13, 4  ;;  %s439_s22 = int_to_ptr.vmem [resolvable:$true] %s438_s22 }
  0x19   : > { %vm718_vm2 = vcmp.ne.s32.totalorder %v145_v16, 0  ;;  %vm739_vm4 = vcmp.ne.s32.totalorder %v184_v34, 0  ;;  %vm756_vm6 = vcmp.ne.s32.totalorder %v223_v53, 0  ;;  %s426_s10 = scalar_lea.sflag [#allocation3], %s108_s5 }
  0x1f   : > { %132 = vrot.lane.b32.xlu1 %v121_v2, %s632_s23  ;;  %128 = vrot.lane.b32.xlu0 %v119_v3, %s632_s23 }
  0x89   : > { %v131_v4 = vpop.permute.xlu1 %130  ;;  %v127_v5 = vpop.permute.xlu0 %126 }
  0x8a   : > { %v141_v6 = vsel %vm138_vm0, %v120_v0, %v131_v4  ;;  %v139_v7 = vsel %vm138_vm0, %v118_v1, %v127_v5  ;;  %v262_v5 = vand.u32 4, %v715_v14 }
  0x8b   : > { %155 = vrot.lane.b32.xlu0 %v141_v6, %s633_s24  ;;  %151 = vrot.lane.b32.xlu2 %v139_v7, %s633_s24 }
  0x8c   : > { %vm769_vm8 = vcmp.ne.s32.totalorder %v262_v5, 0 }
  0x91   : > { %v133_v8 = vpop.permute.xlu1 %132  ;;  %v129_v9 = vpop.permute.xlu0 %128 }
  0x92   : > { %v142_v10 = vsel %vm138_vm0, %v121_v2, %v133_v8  ;;  %v140_v11 = vsel %vm138_vm0, %v119_v3, %v129_v9 }
  0x93   : > { %157 = vrot.lane.b32.xlu1 %v142_v10, %s633_s24  ;;  %165 = vrot.lane.b32.xlu0 %v140_v11, %s634_s25 }
  0x94   : > { %153 = vrot.lane.b32.xlu2 %v140_v11, %s633_s24 }
  0x9b   : > { %167 = vrot.lane.b32.xlu1 %v141_v6, %s634_s25 }
  0x9c   : > { %163 = vrot.lane.b32.xlu2 %v139_v7, %s634_s25 }
  0xa4   : > { %169 = vrot.lane.b32.xlu2 %v142_v10, %s634_s25 }
  0xe5   : > { %v152_v12 = vpop.permute.xlu2 %151 }
  0xee   : > { %v154_v15 = vpop.permute.xlu2 %153 }
  0xf6   : > { %v164_v18 = vpop.permute.xlu2 %163 }
  0xf7   : > { %v176_v19 = vsel %vm175_vm1, %v152_v12, %v164_v18 }
  0xf8   : > { %v180_v20 = vsel %vm718_vm2, %v176_v19, %v139_v7 }
  0xf9   : > { %190 = vrot.lane.b32.xlu0 %v180_v20, %s635_s26 }
  0xfd   : > { %v156_v21 = vpop.permute.xlu0 %155 }
  0xfe   : > { %v170_v22 = vpop.permute.xlu2 %169 }
 0x105   : > { %v158_v23 = vpop.permute.xlu1 %157  ;;  %v166_v24 = vpop.permute.xlu0 %165 }
 0x106   : > { %v179_v25 = vsel %vm175_vm1, %v158_v23, %v170_v22  ;;  %v177_v26 = vsel %vm175_vm1, %v154_v15, %v166_v24 }
 0x107   : > { %v183_v27 = vsel %vm718_vm2, %v179_v25, %v142_v10  ;;  %v181_v28 = vsel %vm718_vm2, %v177_v26, %v140_v11  ;;  %v301_v25 = vand.u32 2, %v715_v14 }
 0x108   : > { %196 = vrot.lane.b32.xlu0 %v183_v27, %s635_s26  ;;  %192 = vrot.lane.b32.xlu1 %v181_v28, %s635_s26 }
 0x109   : > { %vm794_vm10 = vcmp.ne.s32.totalorder %v301_v25, 0 }
 0x10d   : > { %v168_v29 = vpop.permute.xlu1 %167 }
 0x10e   : > { %v178_v30 = vsel %vm175_vm1, %v156_v21, %v168_v29 }
 0x10f   : > { %v182_v31 = vsel %vm718_vm2, %v178_v30, %v141_v6 }
 0x110   : > { %206 = vrot.lane.b32.xlu0 %v182_v31, %s636_s27  ;;  %194 = vrot.lane.b32.xlu2 %v182_v31, %s635_s26 }
 0x111   : > { %202 = vrot.lane.b32.xlu1 %v180_v20, %s636_s27 }
 0x118   : > { %204 = vrot.lane.b32.xlu2 %v181_v28, %s636_s27 }
 0x119   : > { %208 = vrot.lane.b32.xlu1 %v183_v27, %s636_s27 }
 0x16a   : > { %v195_v32 = vpop.permute.xlu2 %194 }
 0x16b   : > { %v191_v33 = vpop.permute.xlu0 %190 }
 0x172   : > { %v205_v35 = vpop.permute.xlu2 %204 }
 0x17a   : > { %v193_v37 = vpop.permute.xlu1 %192  ;;  %v197_v38 = vpop.permute.xlu0 %196 }
 0x17b   : > { %v216_v39 = vsel %vm214_vm3, %v193_v37, %v205_v35 }
 0x17c   : > { %v220_v40 = vsel %vm739_vm4, %v216_v39, %v181_v28 }
 0x17d   : > { %231 = vrot.lane.b32.xlu0 %v220_v40, %s637_s28 }
 0x182   : > { %v207_v41 = vpop.permute.xlu0 %206 }
 0x183   : > { %v203_v42 = vpop.permute.xlu1 %202  ;;  %v217_v43 = vsel %vm214_vm3, %v195_v32, %v207_v41 }
 0x184   : > { %v215_v44 = vsel %vm214_vm3, %v191_v33, %v203_v42  ;;  %v221_v45 = vsel %vm739_vm4, %v217_v43, %v182_v31 }
 0x185   : > { %v219_v46 = vsel %vm739_vm4, %v215_v44, %v180_v20  ;;  %233 = vrot.lane.b32.xlu1 %v221_v45, %s637_s28  ;;  %v340_v44 = vand.u32 1, %v715_v14 }
 0x186   : > { %241 = vrot.lane.b32.xlu0 %v219_v46, %s638_s29  ;;  %229 = vrot.lane.b32.xlu2 %v219_v46, %s637_s28 }
 0x187   : > { %vm822_vm11 = vcmp.ne.s32.totalorder %v340_v44, 0 }
 0x18b   : > { %v209_v47 = vpop.permute.xlu1 %208 }
 0x18c   : > { %v218_v48 = vsel %vm214_vm3, %v197_v38, %v209_v47 }
 0x18d   : > { %v222_v49 = vsel %vm739_vm4, %v218_v48, %v183_v27  ;;  %243 = vrot.lane.b32.xlu1 %v220_v40, %s638_s29 }
 0x18e   : > { %247 = vrot.lane.b32.xlu0 %v222_v49, %s638_s29  ;;  %235 = vrot.lane.b32.xlu2 %v222_v49, %s637_s28 }
 0x196   : > { %245 = vrot.lane.b32.xlu2 %v221_v45, %s638_s29  ;;  %s588_s29 = scalar_lea.hbm %s912_s1, 64 }
 0x1e0   : > { %v230_v50 = vpop.permute.xlu2 %229 }
 0x1e8   : > { %v236_v51 = vpop.permute.xlu2 %235 }
 0x1ef   : > { %v232_v52 = vpop.permute.xlu0 %231 }
 0x1f0   : > { %v246_v55 = vpop.permute.xlu2 %245 }
 0x1f7   : > { %v234_v56 = vpop.permute.xlu1 %233 }
 0x1f8   : > { %v256_v57 = vsel %vm253_vm5, %v234_v56, %v246_v55  ;;  %v242_v58 = vpop.permute.xlu0 %241 }
 0x1f9   : > { %v254_v59 = vsel %vm253_vm5, %v230_v50, %v242_v58  ;;  %v260_v60 = vsel %vm756_vm6, %v256_v57, %v221_v45 }
 0x1fa   : > { %272 = vrot.lane.b32.xlu0 %v260_v60, %s639_s30  ;;  %v258_v61 = vsel %vm756_vm6, %v254_v59, %v219_v46 }
 0x1fb   : > { %268 = vrot.lane.b32.xlu1 %v258_v61, %s639_s30 }
 0x1ff   : > { %v244_v62 = vpop.permute.xlu1 %243 }
 0x200   : > { %v255_v63 = vsel %vm253_vm5, %v232_v52, %v244_v62  ;;  %v248_v0 = vpop.permute.xlu0 %247 }
 0x201   : > { %v257_v1 = vsel %vm253_vm5, %v236_v51, %v248_v0  ;;  %v259_v2 = vsel %vm756_vm6, %v255_v63, %v220_v40 }
 0x202   : > { %282 = vrot.lane.b32.xlu0 %v259_v2, %s640_s2  ;;  %270 = vrot.lane.b32.xlu2 %v259_v2, %s639_s30  ;;  %v261_v3 = vsel %vm756_vm6, %v257_v1, %v222_v49 }
 0x203   : > { %274 = vrot.lane.b32.xlu1 %v261_v3, %s639_s30 }
 0x20a   : > { %280 = vrot.lane.b32.xlu2 %v258_v61, %s640_s2 }
 0x20b   : > { %284 = vrot.lane.b32.xlu1 %v260_v60, %s640_s2 }
 0x212   : > { %286 = vrot.lane.b32.xlu2 %v261_v3, %s640_s2 }
 0x25c   : > { %v271_v4 = vpop.permute.xlu2 %270 }
 0x264   : > { %v281_v6 = vpop.permute.xlu2 %280 }
 0x26c   : > { %v273_v7 = vpop.permute.xlu0 %272  ;;  %v287_v13 = vpop.permute.xlu2 %286 }
 0x26d   : > { %v269_v9 = vpop.permute.xlu1 %268 }
 0x26e   : > { %v293_v10 = vsel %vm292_vm7, %v269_v9, %v281_v6 }
 0x26f   : > { %v297_v11 = vsel %vm769_vm8, %v293_v10, %v258_v61 }
 0x270   : > { %307 = vrot.lane.b32.xlu0 %v297_v11, %s641_s3 }
 0x274   : > { %v283_v12 = vpop.permute.xlu0 %282 }
 0x275   : > { %v275_v15 = vpop.permute.xlu1 %274  ;;  %v294_v16 = vsel %vm292_vm7, %v271_v4, %v283_v12 }
 0x276   : > { %v296_v17 = vsel %vm292_vm7, %v275_v15, %v287_v13  ;;  %v298_v18 = vsel %vm769_vm8, %v294_v16, %v259_v2 }
 0x277   : > { %v300_v19 = vsel %vm769_vm8, %v296_v17, %v261_v3  ;;  %309 = vrot.lane.b32.xlu1 %v298_v18, %s641_s3 }
 0x278   : > { %313 = vrot.lane.b32.xlu0 %v300_v19, %s641_s3 }
 0x27d   : > { %v285_v20 = vpop.permute.xlu1 %284 }
 0x27e   : > { %v295_v21 = vsel %vm292_vm7, %v273_v7, %v285_v20 }
 0x27f   : > { %v299_v22 = vsel %vm769_vm8, %v295_v21, %v260_v60  ;;  %319 = vrot.lane.b32.xlu1 %v297_v11, %s642_s4 }
 0x280   : > { %323 = vrot.lane.b32.xlu0 %v299_v22, %s642_s4  ;;  %311 = vrot.lane.b32.xlu2 %v299_v22, %s641_s3 }
 0x287   : > { %325 = vrot.lane.b32.xlu1 %v300_v19, %s642_s4 }
 0x288   : > { %321 = vrot.lane.b32.xlu2 %v298_v18, %s642_s4 }
 0x2da   : > { %v312_v23 = vpop.permute.xlu2 %311 }
 0x2e2   : > { %v308_v24 = vpop.permute.xlu0 %307  ;;  %v322_v27 = vpop.permute.xlu2 %321 }
 0x2e9   : > { %v310_v28 = vpop.permute.xlu1 %309 }
 0x2ea   : > { %v333_v29 = vsel %vm331_vm9, %v310_v28, %v322_v27  ;;  %v314_v30 = vpop.permute.xlu0 %313 }
 0x2eb   : > { %v337_v31 = vsel %vm794_vm10, %v333_v29, %v298_v18 }
 0x2ec   : > { %348 = vrot.lane.b32.xlu0 %v337_v31, %s641_s3 }
 0x2f1   : > { %v320_v32 = vpop.permute.xlu1 %319 }
 0x2f2   : > { %v332_v33 = vsel %vm331_vm9, %v308_v24, %v320_v32  ;;  %v324_v34 = vpop.permute.xlu0 %323 }
 0x2f3   : > { %v334_v35 = vsel %vm331_vm9, %v312_v23, %v324_v34  ;;  %v336_v36 = vsel %vm794_vm10, %v332_v33, %v297_v11 }
 0x2f4   : > { %358 = vrot.lane.b32.xlu0 %v336_v36, %s642_s4  ;;  %346 = vrot.lane.b32.xlu2 %v336_v36, %s641_s3  ;;  %v338_v37 = vsel %vm794_vm10, %v334_v35, %v299_v22 }
 0x2f5   : > { %350 = vrot.lane.b32.xlu1 %v338_v37, %s641_s3 }
 0x2f9   : > { %v326_v38 = vpop.permute.xlu1 %325 }
 0x2fa   : > { %v335_v39 = vsel %vm331_vm9, %v314_v30, %v326_v38 }
 0x2fb   : > { %v339_v40 = vsel %vm794_vm10, %v335_v39, %v300_v19 }
 0x2fc   : > { %364 = vrot.lane.b32.xlu0 %v339_v40, %s642_s4  ;;  %352 = vrot.lane.b32.xlu2 %v339_v40, %s641_s3 }
 0x2fd   : > { %360 = vrot.lane.b32.xlu1 %v337_v31, %s642_s4 }
 0x304   : > { %362 = vrot.lane.b32.xlu2 %v338_v37, %s642_s4 }
 0x34e   : > { %v347_v41 = vpop.permute.xlu2 %346 }
 0x356   : > { %v353_v42 = vpop.permute.xlu2 %352 }
 0x35e   : > { %v349_v43 = vpop.permute.xlu0 %348  ;;  %v363_v47 = vpop.permute.xlu2 %362 }
 0x366   : > { %v359_v46 = vpop.permute.xlu0 %358 }
 0x367   : > { %v351_v48 = vpop.permute.xlu1 %350  ;;  %v370_v49 = vsel %vm331_vm9, %v347_v41, %v359_v46 }
 0x368   : > { %v372_v50 = vsel %vm331_vm9, %v351_v48, %v363_v47  ;;  %v374_v51 = vsel %vm822_vm11, %v370_v49, %v336_v36 }
 0x369   : > { %v376_v52 = vsel %vm822_vm11, %v372_v50, %v338_v37  ;;  %386 = vrot.lane.b32.xlu1 %v374_v51, %s632_s23  ;;  %378 = vst.msk [vmem:[%s833_s13] sm:$0xff] %vm138_vm0, %v374_v51 }
 0x36a   : > { %390 = vrot.lane.b32.xlu0 %v376_v52, %s632_s23  ;;  %380 = vst.msk [vmem:[%s833_s13 + $0x10] sm:$0xff] %vm138_vm0, %v376_v52 }
 0x36e   : > { %v365_v14 = vpop.permute.xlu0 %364 }
 0x36f   : > { %v361_v53 = vpop.permute.xlu1 %360  ;;  %v373_v54 = vsel %vm331_vm9, %v353_v42, %v365_v14 }
 0x370   : > { %v371_v55 = vsel %vm331_vm9, %v349_v43, %v361_v53  ;;  %v377_v56 = vsel %vm822_vm11, %v373_v54, %v339_v40 }
 0x371   : > { %v375_v57 = vsel %vm822_vm11, %v371_v55, %v337_v31  ;;  %392 = vrot.lane.b32.xlu1 %v377_v56, %s632_s23  ;;  %381 = vst.msk [vmem:[%s833_s13 + $0x18] sm:$0xff] %vm138_vm0, %v377_v56 }
 0x372   : > { %410 = vrot.lane.b32.xlu0 %v375_v57, %s643_s14  ;;  %379 = vst.msk [vmem:[%s833_s13 + $0x8] sm:$0xff] %vm138_vm0, %v375_v57  ;;  %388 = vrot.lane.b32.xlu2 %v375_v57, %s632_s23  ;;  %s440_s23 = sshll.u32 %s437_s21, 4  ;;  %s441_s23 = int_to_ptr.hbm [resolvable:$true] %s440_s23 }
 0x373   : > { %s582_s24 = sshra.s32 %s441_s23, 4  ;;  %s583_s24 = int_to_ptr.hbm [resolvable:$true] %s582_s24 }
 0x374   : > { %s584_s25 = scalar_lea.hbm %s583_s24, 32  ;;  %p589_p0 = scmp.lt.s32.totalorder %s583_s24, %s912_s1 }
 0x375   : > { %p585_p11 = scmp.ne.s32.totalorder %s583_s24, %s584_s25  ;;  %p590_p1 = scmp.lt.s32.totalorder %s588_s29, %s584_s25 }
 0x377   : > { %p586_p12 = pnand %p585_p11, %p693_p5  ;;  %p591_p2 = por %p590_p1, %p589_p0 }
 0x379   : > { %412 = vrot.lane.b32.xlu1 %v376_v52, %s643_s14  ;;  %p587_p13 = pneg %p586_p12 }
 0x37a   : > { %408 = vrot.lane.b32.xlu2 %v374_v51, %s643_s14 }
 0x37b   : > { %p592_p3 = pnand %p591_p2, %p587_p13 }
 0x382   : > { %414 = vrot.lane.b32.xlu2 %v377_v56, %s643_s14 }
 0x3cc   : > { %v389_v58 = vpop.permute.xlu2 %388 }
 0x3cd   : > { %400 = vst.msk [vmem:[%s833_s13 + $0x8] sm:$0xff] %vm398_vm12, %v389_v58 }
 0x3ce   : > { %405 = vst.msk [vmem:[%s833_s13 + $0x8] sm:$0xff] %vm403_vm13, %v389_v58 }
 0x3d4   : > { %v409_v59 = vpop.permute.xlu2 %408 }
 0x3db   : > { %v387_v60 = vpop.permute.xlu1 %386 }
 0x3dc   : > { %399 = vst.msk [vmem:[%s833_s13] sm:$0xff] %vm398_vm12, %v387_v60  ;;  %v391_v61 = vpop.permute.xlu0 %390  ;;  %v415_v0 = vpop.permute.xlu2 %414 }
 0x3dd   : > { %404 = vst.msk [vmem:[%s833_s13] sm:$0xff] %vm403_vm13, %v387_v60 }
 0x3de   : > { %421 = vst.msk [vmem:[%s833_s13] sm:$0xff] %vm420_vm14, %v409_v59 }
 0x3df   : > { %401 = vst.msk [vmem:[%s833_s13 + $0x10] sm:$0xff] %vm398_vm12, %v391_v61 }
 0x3e0   : > { %406 = vst.msk [vmem:[%s833_s13 + $0x10] sm:$0xff] %vm403_vm13, %v391_v61 }
 0x3e3   : > { %v393_v62 = vpop.permute.xlu1 %392 }
 0x3e4   : > { %402 = vst.msk [vmem:[%s833_s13 + $0x18] sm:$0xff] %vm398_vm12, %v393_v62  ;;  %v411_v63 = vpop.permute.xlu0 %410 }
 0x3e5   : > { %407 = vst.msk [vmem:[%s833_s13 + $0x18] sm:$0xff] %vm403_vm13, %v393_v62 }
 0x3e6   : > { %424 = vst.msk [vmem:[%s833_s13 + $0x18] sm:$0xff] %vm420_vm14, %v415_v0 }
 0x3e7   : > { %422 = vst.msk [vmem:[%s833_s13 + $0x8] sm:$0xff] %vm420_vm14, %v411_v63 }
 0x3eb   : > { %v413_v1 = vpop.permute.xlu1 %412 }
 0x3ec   : > { %423 = vst.msk [vmem:[%s833_s13 + $0x10] sm:$0xff] %vm420_vm14, %v413_v1 }
 0x3ed   : > { %595 = shalt.err (!%p592_p3)
}
 0x3ee   : > { %s644_s3 = smov 128  }
 0x3ef   : > { %516 = dma.vmem_to_hbm [thread:$0]  (%p693_p5), %s439_s22, 512, %s441_s23, %s426_s10, %s644_s3, %s644_s3, %s636_s27  }
 0x3f0 PF: > { %p522_p4 = scmp.ge.s32.totalorder %s630_s9, 2  ;;  %s455_s4 = sand.u32 1, %s618_s6  }
 0x3f1   : > { %s456_s5 = scalar_lea.sflag [#allocation3], %s455_s4 }
 0x3f2   : > { %p519_p7 = pnand %p522_p4, %p697_p6 }
 0x3f4   : > { %p520_p8 = pneg %p519_p7 }
 0x3f6   : > { %613 = dma.done.wait (%p520_p8), %s456_s5, 512  }
 0x3f7   : > { %615 = vsyncadd (%p520_p8), %s456_s5, 4294966784  ;;  %p11_p9 = scmp.ge.s32.totalorder %s680_s12, 4   ;;  %s927_s6 = smov %s622_s7 }
 0x3f8   : > { %s928_s7 = smov %s626_s8  ;;  %s929_s8 = smov %s691_s15 }
 0x3f9   : > { %s930_s9 = smov %s680_s12  ;;  %13 = sbr.rel (!%p11_p9) target bundleno = 3 (0x3), region = 59 }
 0x3fe   :  { %462 = vsyncpa [#allocation3], 1 }
 0x3ff   :  { %464 = vsyncpa [#allocation3 + $0x1], 1 }

</bundles_post_ra>
